<compile_context>
chip_gen: v7x
topology: tpu7x:2x2x1
jax: 0.10.0
libtpu: 0.0.40
codegen_flags: <defaults>
</compile_context>

<pallas_src>
import jax
import jax.numpy as jnp
from jax.experimental import pallas as pl
from jax.experimental.pallas import tpu as pltpu


def _silu_kernel(x_ref, o_ref):
    xf = x_ref[...].astype(jnp.float32)
    # Overflow-safe sigmoid: one EUP op, exact saturation at both tails.
    sig = 0.5 * jnp.tanh(0.5 * xf) + 0.5
    o_ref[...] = (xf * sig).astype(o_ref.dtype)


def _block_budget():
    """Per-generation (block_bytes_in_input_dtype, vmem_limit_bytes, is_v7x)."""
    try:
        kind = jax.devices()[0].device_kind.lower()
    except Exception:
        kind = ""
    if "v7" in kind:
        # 3.2 TB/s HBM: 8 MiB in + 8 MiB out, double-buffered = 32 MiB keeps the
        # ~0.35us fixed per-step overhead below ~7%. Raise the scoped VMEM limit
        # explicitly but stay well under v7x's 64 MiB physical VMEM.
        return 8 * 1024 * 1024, 48 * 1024 * 1024, True
    if "v6" in kind:
        # 16 MiB total double-buffered, under the 32 MiB scoped default.
        return 4 * 1024 * 1024, None, False
    # v5e (16 MiB scoped default) and unknown generations: 2 MiB blocks ->
    # 8 MiB double-buffered; per-step overhead already < 7% at 0.82 TB/s.
    return 2 * 1024 * 1024, None, False


def _silu_flat(x_flat):
    """SiLU on a 1-D array whose length is a (nonzero) multiple of 128."""
    n = x_flat.shape[0]
    dtype = x_flat.dtype
    itemsize = jnp.dtype(dtype).itemsize

    # Lane-dense width W (multiple of 128) that divides n -> no padding copy,
    # wide unmasked stores and big contiguous DMA descriptors.
    W = 128
    for cand in (8192, 4096, 2048, 1024, 512, 256):
        if n % cand == 0:
            W = cand
            break
    rows = n // W
    x2d = x_flat.reshape(rows, W)

    # Sublane granularity by dtype packing: 8 rows (32-bit), 16 (16-bit), 32 (8-bit).
    sub = 8 * max(1, 4 // itemsize)

    target_bytes, vmem_limit, is_v7 = _block_budget()
    target_rows = max(1, target_bytes // (itemsize * W))

    if rows <= sub:
        TM = rows                                    # full-dim block is always legal
    else:
        TM = max(sub, min(rows, target_rows))
        TM = max(sub, (TM // sub) * sub)             # keep a multiple of sublane packing
        if is_v7 and pl.cdiv(rows, TM) == 1:
            # v7x megacore: make sure the "parallel" axis has >= 2 steps so both
            # TensorCores get work.
            half = max(sub, (((rows + 1) // 2) // sub) * sub)
            TM = min(TM, half)

    grid = (pl.cdiv(rows, TM),)

    cost = pl.CostEstimate(
        flops=4 * n,
        transcendentals=n,                           # one tanh per element
        bytes_accessed=2 * n * itemsize,
    )

    out2d = pl.pallas_call(
        _silu_kernel,
        out_shape=jax.ShapeDtypeStruct((rows, W), dtype),
        grid_spec=pltpu.PrefetchScalarGridSpec(
            num_scalar_prefetch=0,
            grid=grid,
            in_specs=[pl.BlockSpec((TM, W), lambda i: (i, 0))],
            out_specs=pl.BlockSpec((TM, W), lambda i: (i, 0)),
        ),
        compiler_params=pltpu.CompilerParams(
            dimension_semantics=("parallel",),       # megacore sharding on v7x
            vmem_limit_bytes=vmem_limit,
        ),
        cost_estimate=cost,
    )(x2d)

    return out2d.reshape(-1)


def silu_pallas(x):
    """Elementwise SiLU via Pallas. Accepts any shape; returns same shape/dtype."""
    orig_shape = x.shape
    dtype = x.dtype
    n = x.size
    if n == 0:
        return x

    x_flat = jnp.reshape(x, (-1,))
    n_main = (n // 128) * 128

    if n_main == 0:
        # Tiny tensor (< 128 elements): not worth a kernel launch.
        out_flat = (x_flat * jax.nn.sigmoid(x_flat)).astype(dtype)
    elif n_main == n:
        out_flat = _silu_flat(x_flat)
    else:
        # Ragged count: kernel on the 128-aligned prefix, plain jnp on the
        # <128-element tail. Avoids the pad + slice double pass over HBM.
        main = _silu_flat(x_flat[:n_main])
        tail = x_flat[n_main:]
        tail_out = (tail * jax.nn.sigmoid(tail)).astype(dtype)
        out_flat = jnp.concatenate([main, tail_out])

    return out_flat.reshape(orig_shape)


if __name__ == "__main__":
    key = jax.random.PRNGKey(0)

    # NCHW input consistent with the Autoencoder usage: batch=2, channels=4, 16x16 spatial.
    x = jax.random.normal(key, (2, 4, 16, 16), dtype=jnp.float32)
    y = silu_pallas(x)
    jax.block_until_ready(y)
    y_ref = x * jax.nn.sigmoid(x)
    assert y.shape == x.shape and y.dtype == x.dtype
    assert jnp.max(jnp.abs(y - y_ref)) < 1e-4

    # Ragged element count: exercises the aligned-prefix + jnp-tail path.
    x2 = jax.random.normal(jax.random.PRNGKey(1), (3, 5, 17, 19), dtype=jnp.float32)
    y2 = silu_pallas(x2)
    jax.block_until_ready(y2)
    y2_ref = x2 * jax.nn.sigmoid(x2)
    assert y2.shape == x2.shape and y2.dtype == x2.dtype
    assert jnp.max(jnp.abs(y2 - y2_ref)) < 1e-4

    # Extreme magnitudes: the old exp/recip form produced NaN for x < -88.
    x3 = jnp.concatenate([
        jnp.full((64,), -1e4, jnp.float32),
        jnp.full((64,), 1e4, jnp.float32),
        50.0 * jax.random.normal(jax.random.PRNGKey(2), (128,), jnp.float32),
    ])
    y3 = silu_pallas(x3)
    jax.block_until_ready(y3)
    y3_ref = x3 * jax.nn.sigmoid(x3)
    assert not bool(jnp.any(jnp.isnan(y3)))
    assert jnp.max(jnp.abs(y3 - y3_ref)) < 1e-3

    # bf16 path: dtype-aware block sizing / sublane packing.
    x4 = jax.random.normal(jax.random.PRNGKey(3), (2, 4, 16, 16), dtype=jnp.bfloat16)
    y4 = silu_pallas(x4)
    jax.block_until_ready(y4)
    y4_ref = (x4.astype(jnp.float32) * jax.nn.sigmoid(x4.astype(jnp.float32))).astype(jnp.bfloat16)
    assert y4.shape == x4.shape and y4.dtype == x4.dtype
    assert jnp.max(jnp.abs(y4.astype(jnp.float32) - y4_ref.astype(jnp.float32))) < 2e-2

    print("KERNEL_OK")
</pallas_src>

<mosaic_0001>
module attributes {stable_mosaic.version = 11 : i64} {
  func.func @_silu_kernel(%arg0: i32, %arg1: memref<1x2048xf32, #tpu.memory_space<vmem>>, %arg2: memref<1x2048xf32, #tpu.memory_space<vmem>>) attributes {dimension_semantics = [#tpu.dimension_semantics<parallel>], iteration_bounds = array<i64: 1>, scalar_prefetch = 0 : i64, scratch_operands = 0 : i64, tpu.core_type = #tpu.core_type<tc>, window_params = [{transform_indices = @transform_0, window_bounds = array<i64: 1, 2048>}, {transform_indices = @transform_1, window_bounds = array<i64: 1, 2048>}]} {
    %c0 = arith.constant 0 : index
    %c0_0 = arith.constant 0 : index
    %0 = vector.load %arg1[%c0, %c0_0] : memref<1x2048xf32, #tpu.memory_space<vmem>>, vector<1x2048xf32>
    %cst = arith.constant 5.000000e-01 : f32
    %1 = vector.broadcast %cst : f32 to vector<1x2048xf32>
    %2 = arith.mulf %1, %0 : vector<1x2048xf32>
    %3 = math.tanh %2 : vector<1x2048xf32>
    %cst_1 = arith.constant 5.000000e-01 : f32
    %4 = vector.broadcast %cst_1 : f32 to vector<1x2048xf32>
    %5 = arith.mulf %4, %3 : vector<1x2048xf32>
    %cst_2 = arith.constant 5.000000e-01 : f32
    %6 = vector.broadcast %cst_2 : f32 to vector<1x2048xf32>
    %7 = arith.addf %5, %6 : vector<1x2048xf32>
    %8 = arith.mulf %0, %7 : vector<1x2048xf32>
    %c0_3 = arith.constant 0 : index
    %c0_4 = arith.constant 0 : index
    %9 = vector.load %arg2[%c0_3, %c0_4] : memref<1x2048xf32, #tpu.memory_space<vmem>>, vector<1x2048xf32>
    tpu.vector_store %arg2[%c0_3, %c0_4], %8 {strides = array<i32>} : memref<1x2048xf32, #tpu.memory_space<vmem>>, vector<1x2048xf32>,
    return
  }
  func.func @transform_0(%arg0: i32) -> (i32, i32) {
    %c0_i32 = arith.constant 0 : i32
    %c0_i32_0 = arith.constant 0 : i32
    return %arg0, %c0_i32 : i32, i32
  }
  func.func @transform_1(%arg0: i32) -> (i32, i32) {
    %c0_i32 = arith.constant 0 : i32
    %c0_i32_0 = arith.constant 0 : i32
    return %arg0, %c0_i32 : i32, i32
  }
}

</mosaic_0001>

<bundles_post_ra>
// kernel: tpu_custom_call.1
= control target key start
LH: loop header
LB: loop body
LE: loop exit
PB: predicated region body
PF: predicated region fallthrough
CT: control target
= control target key end

     0   :  { %6 = vsyncpa [#allocation3], 0  ;;  %s140_s0 = inlined_call_operand.hbm [shape: f32[1,2048], index: 0, kind: input, shape index: {}]   ;;  %s141_s1 = inlined_call_operand.hbm [shape: f32[1,2048], index: 1, kind: output, shape index: {}]  }
   0x1   :  { %7 = vsyncpa [#allocation4], 0  ;;  %s104_s6 = smov [#allocation2]   ;;  %s56_s10 = scalar_lea.hbm %s140_s0, 256 }
   0x2   :  { %s14_s7 = sshll.u32 %s104_s6, 4  ;;  %p57_p0 = scmp.ne.s32.totalorder %s140_s0, %s56_s10  ;;  %s15_s7 = int_to_ptr.vmem [resolvable:$true] %s14_s7 }
   0x3   :  { %p60_p1 = scmp.lt.u32.totalorder %s56_s10, %s140_s0 }
   0x5   :  { %p62_p2 = pnand %p60_p1, %p57_p0 }
   0x7   :  { %65 = shalt.err (!%p62_p2)
}
   0x8   :  { %s66_s15 = scalar_lea.vmem %s15_s7, 256  ;;  %p71_p4 = scmp.lt.s32.totalorder %s15_s7, %s15_s7 }
   0x9   :  { %p67_p3 = scmp.ne.s32.totalorder %s15_s7, %s66_s15  ;;  %p72_p5 = scmp.lt.s32.totalorder %s66_s15, %s66_s15 }
   0xb   :  { %p73_p6 = por %p72_p5, %p71_p4 }
   0xd   :  { %p74_p7 = pnand %p73_p6, %p67_p3 }
   0xf   :  { %77 = shalt.err (!%p74_p7)
}
  0x10   :  { %17 = dma.hbm_to_vmem [thread:$0]  %s140_s0, 256, %s15_s7, [#allocation3]  }
  0x11   :  { %100 = dma.done.wait [#allocation3], 256  }
  0x12   :  { %101 = vsyncadd [#allocation3], 4294967040  ;;  %v21_v0 = vld [vmem:[#allocation2] sm:$0xff]  ;;  %v22_v1 = vld [vmem:[#allocation2 + $0x8] sm:$0xff]  ;;  %s105_s18 = smov [#allocation5]  }
  0x13   :  { %v23_v2 = vmul.f32 0.5, %v21_v0  ;;  %v24_v3 = vmul.f32 0.5, %v22_v1  ;;  %s41_s19 = sshll.u32 %s105_s18, 4  ;;  %s42_s19 = int_to_ptr.vmem [resolvable:$true] %s41_s19 }
  0x14   :  { %s78_s0 = scalar_lea.vmem %s42_s19, 256  ;;  %p83_p9 = scmp.lt.s32.totalorder %s42_s19, %s42_s19 }
  0x15   :  { %52 = vtanh.f32 %v23_v2  ;;  %p79_p8 = scmp.ne.s32.totalorder %s42_s19, %s78_s0  ;;  %p84_p10 = scmp.lt.s32.totalorder %s78_s0, %s78_s0 }
  0x16   :  { %54 = vtanh.f32 %v24_v3 }
  0x17   :  { %p85_p11 = por %p84_p10, %p83_p9 }
  0x19   :  { %p86_p12 = pnand %p85_p11, %p79_p8 }
  0x1f   :  { %v53_v4 = vpop.eup %52 }
  0x20   :  { %v55_v5 = vpop.eup %54  ;;  %v27_v6 = vmul.f32 0.5, %v53_v4 }
  0x21   :  { %v28_v7 = vmul.f32 0.5, %v55_v5 }
  0x22   :  { %v29_v8 = vadd.f32 0.5, %v27_v6 }
  0x23   :  { %v30_v9 = vadd.f32 0.5, %v28_v7 }
  0x24   :  { %v31_v10 = vmul.f32 %v29_v8, %v21_v0 }
  0x25   :  { %v32_v11 = vmul.f32 %v30_v9, %v22_v1 }
  0x26   :  { %33 = vst [vmem:[#allocation5] sm:$0xff] %v31_v10 }
  0x27   :  { %34 = vst [vmem:[#allocation5 + $0x8] sm:$0xff] %v32_v11 }
  0x28   :  { %89 = shalt.err (!%p86_p12)
}
  0x29   :  { %s90_s22 = scalar_lea.hbm %s141_s1, 256 }
  0x2a   :  { %p91_p13 = scmp.ne.s32.totalorder %s141_s1, %s90_s22  ;;  %p94_p0 = scmp.lt.u32.totalorder %s90_s22, %s141_s1 }
  0x2c   :  { %p96_p1 = pnand %p94_p0, %p91_p13 }
  0x2e   :  { %99 = shalt.err (!%p96_p1)
}
  0x2f   :  { %44 = dma.vmem_to_hbm [thread:$0]  %s42_s19, 256, %s141_s1, [#allocation4]  }
  0x30   :  { %102 = dma.done.wait [#allocation4], 256  }
  0x31   :  { %103 = vsyncadd [#allocation4], 4294967040 }
  0x32   :  { %48 = vsyncpa [#allocation3], 1 }
  0x33   :  { %49 = vsyncpa [#allocation4], 1 }

</bundles_post_ra>
